<compile_context>
chip_gen: v5e
topology: v5e:2x2
jax: 0.10.0
libtpu: 0.0.40
codegen_flags: <defaults>
</compile_context>

<pallas_src>
import math
from functools import partial

import jax
import jax.numpy as jnp
import numpy as np
from jax.experimental import pallas as pl
from jax.experimental.pallas import tpu as pltpu


def _round_up(x, m):
    return (x + m - 1) // m * m


# ---------------------------------------------------------------------------
# shared math helpers (usable both inside Pallas kernels and in the reference)
# ---------------------------------------------------------------------------
def _layer_norm(x, g, b, eps=1e-5):
    mu = jnp.mean(x, axis=-1, keepdims=True)
    var = jnp.mean((x - mu) ** 2, axis=-1, keepdims=True)
    return (x - mu) * jax.lax.rsqrt(var + eps) * g + b


def _gelu_exact(x):
    # nn.GELU() default is the exact erf formulation.
    return 0.5 * x * (1.0 + jax.lax.erf(x * (1.0 / math.sqrt(2.0))))


# ---------------------------------------------------------------------------
# fused Pallas kernel: grid=(depth,), residual stream x resident in VMEM
# ---------------------------------------------------------------------------
def fused_vit_kernel(x0_ref, wqkv_ref, wo_ref, w1_ref, w2_ref, vec_ref,
                     hvec_ref, wf_ref, wh_ref,
                     logits_ref, feats_ref, x_scr,
                     *, heads, dim_head, dim, mlp_dim, n_feats, n_classes,
                     n_real, n_pad):
    l = pl.program_id(0)
    inner = heads * dim_head

    @pl.when(l == 0)
    def _():
        x_scr[...] = x0_ref[...].astype(jnp.float32)

    x = x_scr[...]                                     # (N, D) residual, f32

    vecs = vec_ref[...]                                # (8, maxw) packed slab
    ln1_g = vecs[0:1, :dim]
    ln1_b = vecs[1:2, :dim]
    bo = vecs[2:3, :dim]
    ln2_g = vecs[3:4, :dim]
    ln2_b = vecs[4:5, :dim]
    b1 = vecs[5:6, :mlp_dim]
    b2 = vecs[6:7, :dim]

    # --- PreLN multi-head attention ----------------------------------------
    xn = _layer_norm(x, ln1_g, ln1_b)
    # single fused lane-dense QKV matmul (scale already folded into Q cols)
    qkv = jnp.dot(xn.astype(jnp.bfloat16), wqkv_ref[...],
                  preferred_element_type=jnp.float32)          # (N, 3*inner)

    outs = []
    for h in range(heads):                              # static unroll over H
        q_h = qkv[:, h * dim_head:(h + 1) * dim_head]                # (N,dh)
        k_h = qkv[:, inner + h * dim_head:inner + (h + 1) * dim_head]
        v_h = qkv[:, 2 * inner + h * dim_head:2 * inner + (h + 1) * dim_head]
        # q @ k^T without materializing a transpose
        dots = jax.lax.dot_general(q_h, k_h, (((1,), (1,)), ((), ())),
                                   preferred_element_type=jnp.float32)
        if n_pad > n_real:
            key_ok = jax.lax.broadcasted_iota(jnp.int32, dots.shape, 1) < n_real
            dots = jnp.where(key_ok, dots, jnp.float32(-1e30))
        dots = dots - jnp.max(dots, axis=-1, keepdims=True)
        e = jnp.exp(dots)
        attn = e * pl.reciprocal(jnp.sum(e, axis=-1, keepdims=True),
                                 approx=True)
        outs.append(jnp.dot(attn, v_h, preferred_element_type=jnp.float32))
    # head-major concat == torch's transpose(1,2).reshape(b, n, h*dh)
    att = jnp.concatenate(outs, axis=-1)                         # (N, inner)
    # single (N, inner) @ (inner, D) output projection
    proj = jnp.dot(att.astype(jnp.bfloat16), wo_ref[...],
                   preferred_element_type=jnp.float32) + bo
    x = x + proj

    # --- PreLN feed-forward (exact GELU) ------------------------------------
    xn2 = _layer_norm(x, ln2_g, ln2_b)
    h1 = _gelu_exact(jnp.dot(xn2.astype(jnp.bfloat16), w1_ref[...],
                             preferred_element_type=jnp.float32) + b1)
    h2 = jnp.dot(h1.astype(jnp.bfloat16), w2_ref[...],
                 preferred_element_type=jnp.float32) + b2
    x = x + h2
    x_scr[...] = x

    # --- head: final LN + cls pool + to_feats + mlp_head (last layer only) --
    @pl.when(l == pl.num_programs(0) - 1)
    def _():
        hv = hvec_ref[...]                               # (8, hmax)
        lnf_g = hv[0:1, :dim]
        lnf_b = hv[1:2, :dim]
        bf = hv[2:3, :n_feats]
        bh = hv[3:4, :n_classes]
        x0 = x[0:1, :]                                   # cls token ('cls' pool)
        xh = _layer_norm(x0, lnf_g, lnf_b)
        feats = jnp.dot(xh, wf_ref[...],
                        preferred_element_type=jnp.float32) + bf
        logits = jnp.dot(feats, wh_ref[...],
                         preferred_element_type=jnp.float32) + bh
        feats_ref[...] = feats.astype(feats_ref.dtype)
        logits_ref[...] = logits.astype(logits_ref.dtype)


# ---------------------------------------------------------------------------
# host-side packing: depth-stacked bf16 weights, lane-dense bias slabs.
# Run ONCE at model load (hoisted out of the forward path).
# ---------------------------------------------------------------------------
def pack_params(params, *, heads, dim_head):
    layers = params["layers"]
    depth = len(layers)
    dim = params["cls_token"].shape[-1]
    inner = heads * dim_head
    mlp_dim = layers[0]["w1"].shape[1]
    F = params["wf"].shape[1]
    C = params["wh"].shape[1]
    maxw = _round_up(max(dim, mlp_dim), 128)     # lane-dense slab width
    hmax = _round_up(max(dim, F, C), 128)
    scale = dim_head ** (-0.5)

    def pad_row(v, w):
        v = jnp.asarray(v, jnp.float32).reshape(1, -1)
        return jnp.pad(v, ((0, 0), (0, w - v.shape[-1])))

    # fold the attention scale into the Q columns of the fused QKV weight
    def scaled_qkv(w):
        return jnp.concatenate([w[:, :inner] * scale, w[:, inner:]], axis=1)

    WQKV = jnp.stack([scaled_qkv(lp["wqkv"]) for lp in layers]).astype(jnp.bfloat16)
    WO = jnp.stack([lp["wo"] for lp in layers]).astype(jnp.bfloat16)
    W1 = jnp.stack([lp["w1"] for lp in layers]).astype(jnp.bfloat16)
    W2 = jnp.stack([lp["w2"] for lp in layers]).astype(jnp.bfloat16)
    VEC = jnp.stack([
        jnp.concatenate([
            pad_row(lp["ln1_g"], maxw), pad_row(lp["ln1_b"], maxw),
            pad_row(lp["bo"], maxw),
            pad_row(lp["ln2_g"], maxw), pad_row(lp["ln2_b"], maxw),
            pad_row(lp["b1"], maxw), pad_row(lp["b2"], maxw),
            jnp.zeros((1, maxw), jnp.float32)], axis=0)
        for lp in layers])                                  # (depth, 8, maxw)
    HVEC = jnp.concatenate([
        pad_row(params["lnf_g"], hmax), pad_row(params["lnf_b"], hmax),
        pad_row(params["bf"], hmax), pad_row(params["bh"], hmax),
        jnp.zeros((4, hmax), jnp.float32)], axis=0)         # (8, hmax)

    return dict(
        cls_token=jnp.asarray(params["cls_token"], jnp.float32),
        WQKV=WQKV, WK=None, WO=WO, W1=W1, W2=W2, VEC=VEC, HVEC=HVEC,
        WF=jnp.asarray(params["wf"], jnp.float32),
        WH=jnp.asarray(params["wh"], jnp.float32),
        cfg=dict(depth=depth, dim=dim, heads=heads, dim_head=dim_head,
                 inner=inner, mlp_dim=mlp_dim, F=F, C=C,
                 maxw=maxw, hmax=hmax))


# ---------------------------------------------------------------------------
# wrapper
# ---------------------------------------------------------------------------
def vit_forward(x_path, packed):
    """Pallas implementation of ViT.forward (no tabular input, return_feats)."""
    cfg = packed["cfg"]
    depth, D = cfg["depth"], cfg["dim"]
    heads, dim_head, inner = cfg["heads"], cfg["dim_head"], cfg["inner"]
    mlp_dim, F, C = cfg["mlp_dim"], cfg["F"], cfg["C"]
    maxw, hmax = cfg["maxw"], cfg["hmax"]

    # glue: prepend cls token (torch.cat((cls_tokens, x), dim=1), batch=1);
    # eval-mode: emb_dropout / dropout layers are identity.
    x = jnp.concatenate([packed["cls_token"],
                         x_path.astype(jnp.float32)], axis=0)       # (N, D)
    n_real = x.shape[0]
    n_pad = _round_up(n_real, 8)                      # sublane-aligned seq len
    if n_pad > n_real:
        x = jnp.pad(x, ((0, n_pad - n_real), (0, 0)))

    def stacked(tail):
        nd = len(tail)
        return pl.BlockSpec((None,) + tuple(tail),
                            lambda l, _nd=nd: (l,) + (0,) * _nd)

    def const(shape):
        nd = len(shape)
        return pl.BlockSpec(tuple(shape), lambda l, _nd=nd: (0,) * _nd)

    kern = partial(fused_vit_kernel, heads=heads, dim_head=dim_head,
                   dim=D, mlp_dim=mlp_dim, n_feats=F, n_classes=C,
                   n_real=n_real, n_pad=n_pad)

    grid_spec = pltpu.PrefetchScalarGridSpec(
        num_scalar_prefetch=0,
        grid=(depth,),
        in_specs=[
            const((n_pad, D)),                       # x0 (initial sequence)
            stacked((D, 3 * inner)),                 # fused QKV (depth,D,3I)
            stacked((inner, D)),                     # WO  (depth, inner, D)
            stacked((D, mlp_dim)),                   # W1
            stacked((mlp_dim, D)),                   # W2
            stacked((8, maxw)),                      # packed LN/bias slab
            const((8, hmax)),                        # packed head vec slab
            const((D, F)),                           # to_feats weight (f32)
            const((F, C)),                           # mlp_head weight (f32)
        ],
        out_specs=(const((1, C)), const((1, F))),
        scratch_shapes=[pltpu.VMEM((n_pad, D), jnp.float32)],
    )

    # explicit VMEM budget: 2x double-buffered per-layer weights + constants
    # + residual scratch + activation headroom (scales with real ViT sizes).
    wbytes_layer = 2 * (D * 3 * inner + inner * D + 2 * D * mlp_dim)  # bf16
    wbytes_layer += 4 * 8 * maxw                                       # f32 slab
    const_bytes = 4 * (n_pad * D + 8 * hmax + D * F + F * C + C + F)
    act_bytes = 4 * n_pad * (3 * inner + mlp_dim + heads * n_pad + 8 * D)
    vmem_bytes = 2 * wbytes_layer + 2 * const_bytes + 4 * n_pad * D + act_bytes
    vmem_bytes = int(min(max(2 * vmem_bytes, 16 * 2 ** 20), 100 * 2 ** 20))

    logits, feats = pl.pallas_call(
        kern,
        grid_spec=grid_spec,
        out_shape=(jax.ShapeDtypeStruct((1, C), jnp.float32),
                   jax.ShapeDtypeStruct((1, F), jnp.float32)),
        compiler_params=pltpu.CompilerParams(
            dimension_semantics=("arbitrary",),
            vmem_limit_bytes=vmem_bytes),
    )(x, packed["WQKV"], packed["WO"], packed["W1"], packed["W2"],
      packed["VEC"], packed["HVEC"], packed["WF"], packed["WH"])
    return logits, feats


# ---------------------------------------------------------------------------
# pure-JAX reference (same math as the PyTorch module, f32, no Pallas)
# ---------------------------------------------------------------------------
def vit_reference(x_path, params, *, heads, dim_head):
    x = jnp.concatenate([params["cls_token"], x_path], axis=0)
    inner = heads * dim_head
    scale = dim_head ** (-0.5)
    for lp in params["layers"]:
        xn = _layer_norm(x, lp["ln1_g"], lp["ln1_b"])
        qkv = jnp.dot(xn, lp["wqkv"], preferred_element_type=jnp.float32)
        q, k, v = qkv[:, :inner], qkv[:, inner:2 * inner], qkv[:, 2 * inner:]
        outs = []
        for h in range(heads):
            sl = slice(h * dim_head, (h + 1) * dim_head)
            dots = jnp.dot(q[:, sl], k[:, sl].T,
                           preferred_element_type=jnp.float32) * scale
            attn = jax.nn.softmax(dots, axis=-1)
            outs.append(jnp.dot(attn, v[:, sl],
                                preferred_element_type=jnp.float32))
        att = jnp.concatenate(outs, axis=-1)
        att = jnp.dot(att, lp["wo"], preferred_element_type=jnp.float32) + lp["bo"]
        x = x + att
        xn2 = _layer_norm(x, lp["ln2_g"], lp["ln2_b"])
        h1 = _gelu_exact(jnp.dot(xn2, lp["w1"],
                                 preferred_element_type=jnp.float32) + lp["b1"])
        h2 = jnp.dot(h1, lp["w2"], preferred_element_type=jnp.float32) + lp["b2"]
        x = x + h2
    x0 = _layer_norm(x[0:1, :], params["lnf_g"], params["lnf_b"])
    feats = jnp.dot(x0, params["wf"],
                    preferred_element_type=jnp.float32) + params["bf"]
    logits = jnp.dot(feats, params["wh"],
                     preferred_element_type=jnp.float32) + params["bh"]
    return logits, feats


# ---------------------------------------------------------------------------
# deterministic parameter init (xavier_normal_ for Linear weights, zero biases,
# LayerNorm gamma=1 / beta=0, cls_token ~ randn) — synthetic, not a checkpoint.
# ---------------------------------------------------------------------------
def _xavier(key, fan_in, fan_out):
    std = math.sqrt(2.0 / (fan_in + fan_out))
    return jax.random.normal(key, (fan_in, fan_out), jnp.float32) * std


def init_params(key, *, dim, depth, heads, dim_head, mlp_dim,
                target_features, n_classes):
    inner = heads * dim_head
    n_keys = depth * 4 + 3
    keys = iter(jax.random.split(key, n_keys))

    layers = []
    for _ in range(depth):
        layers.append(dict(
            ln1_g=jnp.ones((1, dim), jnp.float32),
            ln1_b=jnp.zeros((1, dim), jnp.float32),
            wqkv=_xavier(next(keys), dim, 3 * inner),        # to_qkv (no bias)
            wo=_xavier(next(keys), inner, dim),              # to_out Linear
            bo=jnp.zeros((1, dim), jnp.float32),
            ln2_g=jnp.ones((1, dim), jnp.float32),
            ln2_b=jnp.zeros((1, dim), jnp.float32),
            w1=_xavier(next(keys), dim, mlp_dim),
            b1=jnp.zeros((1, mlp_dim), jnp.float32),
            w2=_xavier(next(keys), mlp_dim, dim),
            b2=jnp.zeros((1, dim), jnp.float32),
        ))

    return dict(
        cls_token=jax.random.normal(next(keys), (1, dim), jnp.float32),
        layers=layers,
        lnf_g=jnp.ones((1, dim), jnp.float32),
        lnf_b=jnp.zeros((1, dim), jnp.float32),
        wf=_xavier(next(keys), dim, target_features),        # to_feats
        bf=jnp.zeros((1, target_features), jnp.float32),
        wh=_xavier(next(keys), target_features, n_classes),  # mlp_head
        bh=jnp.zeros((1, n_classes), jnp.float32),
    )


# ---------------------------------------------------------------------------
if __name__ == "__main__":
    # small shapes consistent with the module's forward
    dim = 32            # path_input_dim == model_dim (fc is None)
    depth = 2
    heads = 4           # mha_heads
    dim_head = 16
    mlp_dim = 64
    target_features = 16
    n_classes = 4
    n_patches = 7       # sequence length becomes 8 after the cls token

    key = jax.random.PRNGKey(0)
    k_par, k_x = jax.random.split(key)
    params = init_params(k_par, dim=dim, depth=depth, heads=heads,
                         dim_head=dim_head, mlp_dim=mlp_dim,
                         target_features=target_features, n_classes=n_classes)
    x_path = jax.random.normal(k_x, (n_patches, dim), jnp.float32)

    # pack once at "model load" time (hoisted out of the forward path)
    packed = pack_params(params, heads=heads, dim_head=dim_head)

    logits, feats = vit_forward(x_path, packed)
    jax.block_until_ready(logits)

    ref_logits, ref_feats = vit_reference(x_path, params,
                                          heads=heads, dim_head=dim_head)
    # bf16 transformer weights (per perf review) vs f32 reference -> slightly
    # looser tolerance; accumulation / LN / softmax stay f32.
    np.testing.assert_allclose(np.asarray(logits), np.asarray(ref_logits),
                               rtol=2e-2, atol=2e-2)
    np.testing.assert_allclose(np.asarray(feats), np.asarray(ref_feats),
                               rtol=2e-2, atol=2e-2)

    print("KERNEL_OK")
</pallas_src>

<mosaic_0001>
module attributes {stable_mosaic.version = 11 : i64} {
  func.func @fused_vit_kernel(%arg0: i32, %arg1: memref<8x32xf32, #tpu.memory_space<vmem>>, %arg2: memref<1x32x192xbf16, #tpu.memory_space<vmem>>, %arg3: memref<1x64x32xbf16, #tpu.memory_space<vmem>>, %arg4: memref<1x32x64xbf16, #tpu.memory_space<vmem>>, %arg5: memref<1x64x32xbf16, #tpu.memory_space<vmem>>, %arg6: memref<1x8x128xf32, #tpu.memory_space<vmem>>, %arg7: memref<8x128xf32, #tpu.memory_space<vmem>>, %arg8: memref<32x16xf32, #tpu.memory_space<vmem>>, %arg9: memref<16x4xf32, #tpu.memory_space<vmem>>, %arg10: memref<1x4xf32, #tpu.memory_space<vmem>>, %arg11: memref<1x16xf32, #tpu.memory_space<vmem>>, %arg12: memref<8x32xf32, #tpu.memory_space<vmem>>) attributes {dimension_semantics = [#tpu.dimension_semantics<arbitrary>], iteration_bounds = array<i64: 2>, scalar_prefetch = 0 : i64, scratch_operands = 1 : i64, tpu.core_type = #tpu.core_type<tc>, window_params = [{pipeline_mode = #tpu.pipeline_mode<synchronous>, transform_indices = @transform_0, window_bounds = array<i64: 8, 32>}, {transform_indices = @transform_1, window_bounds = array<i64: 1, 32, 192>}, {transform_indices = @transform_2, window_bounds = array<i64: 1, 64, 32>}, {transform_indices = @transform_3, window_bounds = array<i64: 1, 32, 64>}, {transform_indices = @transform_4, window_bounds = array<i64: 1, 64, 32>}, {transform_indices = @transform_5, window_bounds = array<i64: 1, 8, 128>}, {pipeline_mode = #tpu.pipeline_mode<synchronous>, transform_indices = @transform_6, window_bounds = array<i64: 8, 128>}, {pipeline_mode = #tpu.pipeline_mode<synchronous>, transform_indices = @transform_7, window_bounds = array<i64: 32, 16>}, {pipeline_mode = #tpu.pipeline_mode<synchronous>, transform_indices = @transform_8, window_bounds = array<i64: 16, 4>}, {pipeline_mode = #tpu.pipeline_mode<synchronous>, transform_indices = @transform_9, window_bounds = array<i64: 1, 4>}, {pipeline_mode = #tpu.pipeline_mode<synchronous>, transform_indices = @transform_10, window_bounds = array<i64: 1, 16>}]} {
    %c0_i32 = arith.constant 0 : i32
    %0 = arith.cmpi eq, %arg0, %c0_i32 : i32
    %1 = arith.extui %0 : i1 to i32
    %c0_i32_0 = arith.constant 0 : i32
    %2 = arith.cmpi ne, %1, %c0_i32_0 : i32
    scf.if %2 {
      %c0_52 = arith.constant 0 : index
      %c0_53 = arith.constant 0 : index
      %154 = vector.load %arg1[%c0_52, %c0_53] : memref<8x32xf32, #tpu.memory_space<vmem>>, vector<8x32xf32>
      %c0_54 = arith.constant 0 : index
      %c0_55 = arith.constant 0 : index
      %155 = vector.load %arg12[%c0_54, %c0_55] : memref<8x32xf32, #tpu.memory_space<vmem>>, vector<8x32xf32>
      tpu.vector_store %arg12[%c0_54, %c0_55], %154 {strides = array<i32>} : memref<8x32xf32, #tpu.memory_space<vmem>>, vector<8x32xf32>,
    } else {
    }
    %c0 = arith.constant 0 : index
    %c0_1 = arith.constant 0 : index
    %3 = vector.load %arg12[%c0, %c0_1] : memref<8x32xf32, #tpu.memory_space<vmem>>, vector<8x32xf32>
    %c0_2 = arith.constant 0 : index
    %c0_3 = arith.constant 0 : index
    %c0_4 = arith.constant 0 : index
    %4 = vector.load %arg6[%c0_2, %c0_3, %c0_4] : memref<1x8x128xf32, #tpu.memory_space<vmem>>, vector<1x8x128xf32>
    %5 = vector.shape_cast %4 : vector<1x8x128xf32> to vector<8x128xf32>
    %6 = vector.extract_strided_slice %5 {offsets = [0, 0], sizes = [1, 32], strides = [1, 1]} : vector<8x128xf32> to vector<1x32xf32>
    %7 = vector.extract_strided_slice %5 {offsets = [1, 0], sizes = [1, 32], strides = [1, 1]} : vector<8x128xf32> to vector<1x32xf32>
    %8 = vector.extract_strided_slice %5 {offsets = [2, 0], sizes = [1, 32], strides = [1, 1]} : vector<8x128xf32> to vector<1x32xf32>
    %9 = vector.extract_strided_slice %5 {offsets = [3, 0], sizes = [1, 32], strides = [1, 1]} : vector<8x128xf32> to vector<1x32xf32>
    %10 = vector.extract_strided_slice %5 {offsets = [4, 0], sizes = [1, 32], strides = [1, 1]} : vector<8x128xf32> to vector<1x32xf32>
    %11 = vector.extract_strided_slice %5 {offsets = [5, 0], sizes = [1, 64], strides = [1, 1]} : vector<8x128xf32> to vector<1x64xf32>
    %12 = vector.extract_strided_slice %5 {offsets = [6, 0], sizes = [1, 32], strides = [1, 1]} : vector<8x128xf32> to vector<1x32xf32>
    %cst = arith.constant dense<0.000000e+00> : vector<8xf32>
    %13 = vector.multi_reduction <add>, %3, %cst [1] : vector<8x32xf32> to vector<8xf32>
    %14 = vector.shape_cast %13 : vector<8xf32> to vector<8x1xf32>
    %cst_5 = arith.constant 3.200000e+01 : f32
    %15 = vector.broadcast %cst_5 : f32 to vector<8x1xf32>
    %16 = arith.divf %14, %15 : vector<8x1xf32>
    %17 = vector.broadcast %16 : vector<8x1xf32> to vector<8x32xf32>
    %18 = arith.subf %3, %17 : vector<8x32xf32>
    %19 = arith.mulf %18, %18 : vector<8x32xf32>
    %cst_6 = arith.constant dense<0.000000e+00> : vector<8xf32>
    %20 = vector.multi_reduction <add>, %19, %cst_6 [1] : vector<8x32xf32> to vector<8xf32>
    %21 = vector.shape_cast %20 : vector<8xf32> to vector<8x1xf32>
    %cst_7 = arith.constant 3.200000e+01 : f32
    %22 = vector.broadcast %cst_7 : f32 to vector<8x1xf32>
    %23 = arith.divf %21, %22 : vector<8x1xf32>
    %24 = vector.broadcast %16 : vector<8x1xf32> to vector<8x32xf32>
    %25 = arith.subf %3, %24 : vector<8x32xf32>
    %cst_8 = arith.constant 9.99999974E-6 : f32
    %26 = vector.broadcast %cst_8 : f32 to vector<8x1xf32>
    %27 = arith.addf %23, %26 : vector<8x1xf32>
    %28 = math.rsqrt %27 : vector<8x1xf32>
    %29 = vector.broadcast %28 : vector<8x1xf32> to vector<8x32xf32>
    %30 = arith.mulf %25, %29 : vector<8x32xf32>
    %31 = vector.broadcast %6 : vector<1x32xf32> to vector<8x32xf32>
    %32 = arith.mulf %30, %31 : vector<8x32xf32>
    %33 = vector.broadcast %7 : vector<1x32xf32> to vector<8x32xf32>
    %34 = arith.addf %32, %33 : vector<8x32xf32>
    %35 = arith.truncf %34 : vector<8x32xf32> to vector<8x32xbf16>
    %c0_9 = arith.constant 0 : index
    %c0_10 = arith.constant 0 : index
    %c0_11 = arith.constant 0 : index
    %36 = vector.load %arg2[%c0_9, %c0_10, %c0_11] : memref<1x32x192xbf16, #tpu.memory_space<vmem>>, vector<1x32x192xbf16>
    %37 = vector.shape_cast %36 : vector<1x32x192xbf16> to vector<32x192xbf16>
    %cst_12 = arith.constant dense<0.000000e+00> : vector<8x192xf32>
    %38 = tpu.matmul %35, %37, %cst_12 {dimension_numbers = #tpu.dot_dimension_numbers<[1], [0], [0], [1], [0, 0, 1, 1], [], []>} : vector<8x32xbf16>, vector<32x192xbf16>, vector<8x192xf32> -> vector<8x192xf32>
    %39 = vector.extract_strided_slice %38 {offsets = [0, 0], sizes = [8, 16], strides = [1, 1]} : vector<8x192xf32> to vector<8x16xf32>
    %40 = vector.extract_strided_slice %38 {offsets = [0, 64], sizes = [8, 16], strides = [1, 1]} : vector<8x192xf32> to vector<8x16xf32>
    %41 = vector.extract_strided_slice %38 {offsets = [0, 128], sizes = [8, 16], strides = [1, 1]} : vector<8x192xf32> to vector<8x16xf32>
    %cst_13 = arith.constant dense<0.000000e+00> : vector<8x8xf32>
    %42 = tpu.matmul %39, %40, %cst_13 {dimension_numbers = #tpu.dot_dimension_numbers<[1], [1], [0], [0], [0, 0, 1, 0], [], []>} : vector<8x16xf32>, vector<8x16xf32>, vector<8x8xf32> -> vector<8x8xf32>
    %cst_14 = arith.constant dense<0xFF800000> : vector<8xf32>
    %43 = vector.multi_reduction <maximumf>, %42, %cst_14 [1] : vector<8x8xf32> to vector<8xf32>
    %44 = vector.shape_cast %43 : vector<8xf32> to vector<8x1xf32>
    %45 = vector.broadcast %44 : vector<8x1xf32> to vector<8x8xf32>
    %46 = arith.subf %42, %45 : vector<8x8xf32>
    %47 = math.exp %46 : vector<8x8xf32>
    %cst_15 = arith.constant dense<0.000000e+00> : vector<8xf32>
    %48 = vector.multi_reduction <add>, %47, %cst_15 [1] : vector<8x8xf32> to vector<8xf32>
    %49 = vector.shape_cast %48 : vector<8xf32> to vector<8x1xf32>
    %50 = tpu.reciprocal %49 {approx = true} : vector<8x1xf32> -> vector<8x1xf32>
    %51 = vector.broadcast %50 : vector<8x1xf32> to vector<8x8xf32>
    %52 = arith.mulf %47, %51 : vector<8x8xf32>
    %cst_16 = arith.constant dense<0.000000e+00> : vector<8x16xf32>
    %53 = tpu.matmul %52, %41, %cst_16 {dimension_numbers = #tpu.dot_dimension_numbers<[1], [0], [0], [1], [0, 0, 1, 1], [], []>} : vector<8x8xf32>, vector<8x16xf32>, vector<8x16xf32> -> vector<8x16xf32>
    %54 = vector.extract_strided_slice %38 {offsets = [0, 16], sizes = [8, 16], strides = [1, 1]} : vector<8x192xf32> to vector<8x16xf32>
    %55 = vector.extract_strided_slice %38 {offsets = [0, 80], sizes = [8, 16], strides = [1, 1]} : vector<8x192xf32> to vector<8x16xf32>
    %56 = vector.extract_strided_slice %38 {offsets = [0, 144], sizes = [8, 16], strides = [1, 1]} : vector<8x192xf32> to vector<8x16xf32>
    %cst_17 = arith.constant dense<0.000000e+00> : vector<8x8xf32>
    %57 = tpu.matmul %54, %55, %cst_17 {dimension_numbers = #tpu.dot_dimension_numbers<[1], [1], [0], [0], [0, 0, 1, 0], [], []>} : vector<8x16xf32>, vector<8x16xf32>, vector<8x8xf32> -> vector<8x8xf32>
    %cst_18 = arith.constant dense<0xFF800000> : vector<8xf32>
    %58 = vector.multi_reduction <maximumf>, %57, %cst_18 [1] : vector<8x8xf32> to vector<8xf32>
    %59 = vector.shape_cast %58 : vector<8xf32> to vector<8x1xf32>
    %60 = vector.broadcast %59 : vector<8x1xf32> to vector<8x8xf32>
    %61 = arith.subf %57, %60 : vector<8x8xf32>
    %62 = math.exp %61 : vector<8x8xf32>
    %cst_19 = arith.constant dense<0.000000e+00> : vector<8xf32>
    %63 = vector.multi_reduction <add>, %62, %cst_19 [1] : vector<8x8xf32> to vector<8xf32>
    %64 = vector.shape_cast %63 : vector<8xf32> to vector<8x1xf32>
    %65 = tpu.reciprocal %64 {approx = true} : vector<8x1xf32> -> vector<8x1xf32>
    %66 = vector.broadcast %65 : vector<8x1xf32> to vector<8x8xf32>
    %67 = arith.mulf %62, %66 : vector<8x8xf32>
    %cst_20 = arith.constant dense<0.000000e+00> : vector<8x16xf32>
    %68 = tpu.matmul %67, %56, %cst_20 {dimension_numbers = #tpu.dot_dimension_numbers<[1], [0], [0], [1], [0, 0, 1, 1], [], []>} : vector<8x8xf32>, vector<8x16xf32>, vector<8x16xf32> -> vector<8x16xf32>
    %69 = vector.extract_strided_slice %38 {offsets = [0, 32], sizes = [8, 16], strides = [1, 1]} : vector<8x192xf32> to vector<8x16xf32>
    %70 = vector.extract_strided_slice %38 {offsets = [0, 96], sizes = [8, 16], strides = [1, 1]} : vector<8x192xf32> to vector<8x16xf32>
    %71 = vector.extract_strided_slice %38 {offsets = [0, 160], sizes = [8, 16], strides = [1, 1]} : vector<8x192xf32> to vector<8x16xf32>
    %cst_21 = arith.constant dense<0.000000e+00> : vector<8x8xf32>
    %72 = tpu.matmul %69, %70, %cst_21 {dimension_numbers = #tpu.dot_dimension_numbers<[1], [1], [0], [0], [0, 0, 1, 0], [], []>} : vector<8x16xf32>, vector<8x16xf32>, vector<8x8xf32> -> vector<8x8xf32>
    %cst_22 = arith.constant dense<0xFF800000> : vector<8xf32>
    %73 = vector.multi_reduction <maximumf>, %72, %cst_22 [1] : vector<8x8xf32> to vector<8xf32>
    %74 = vector.shape_cast %73 : vector<8xf32> to vector<8x1xf32>
    %75 = vector.broadcast %74 : vector<8x1xf32> to vector<8x8xf32>
    %76 = arith.subf %72, %75 : vector<8x8xf32>
    %77 = math.exp %76 : vector<8x8xf32>
    %cst_23 = arith.constant dense<0.000000e+00> : vector<8xf32>
    %78 = vector.multi_reduction <add>, %77, %cst_23 [1] : vector<8x8xf32> to vector<8xf32>
    %79 = vector.shape_cast %78 : vector<8xf32> to vector<8x1xf32>
    %80 = tpu.reciprocal %79 {approx = true} : vector<8x1xf32> -> vector<8x1xf32>
    %81 = vector.broadcast %80 : vector<8x1xf32> to vector<8x8xf32>
    %82 = arith.mulf %77, %81 : vector<8x8xf32>
    %cst_24 = arith.constant dense<0.000000e+00> : vector<8x16xf32>
    %83 = tpu.matmul %82, %71, %cst_24 {dimension_numbers = #tpu.dot_dimension_numbers<[1], [0], [0], [1], [0, 0, 1, 1], [], []>} : vector<8x8xf32>, vector<8x16xf32>, vector<8x16xf32> -> vector<8x16xf32>
    %84 = vector.extract_strided_slice %38 {offsets = [0, 48], sizes = [8, 16], strides = [1, 1]} : vector<8x192xf32> to vector<8x16xf32>
    %85 = vector.extract_strided_slice %38 {offsets = [0, 112], sizes = [8, 16], strides = [1, 1]} : vector<8x192xf32> to vector<8x16xf32>
    %86 = vector.extract_strided_slice %38 {offsets = [0, 176], sizes = [8, 16], strides = [1, 1]} : vector<8x192xf32> to vector<8x16xf32>
    %cst_25 = arith.constant dense<0.000000e+00> : vector<8x8xf32>
    %87 = tpu.matmul %84, %85, %cst_25 {dimension_numbers = #tpu.dot_dimension_numbers<[1], [1], [0], [0], [0, 0, 1, 0], [], []>} : vector<8x16xf32>, vector<8x16xf32>, vector<8x8xf32> -> vector<8x8xf32>
    %cst_26 = arith.constant dense<0xFF800000> : vector<8xf32>
    %88 = vector.multi_reduction <maximumf>, %87, %cst_26 [1] : vector<8x8xf32> to vector<8xf32>
    %89 = vector.shape_cast %88 : vector<8xf32> to vector<8x1xf32>
    %90 = vector.broadcast %89 : vector<8x1xf32> to vector<8x8xf32>
    %91 = arith.subf %87, %90 : vector<8x8xf32>
    %92 = math.exp %91 : vector<8x8xf32>
    %cst_27 = arith.constant dense<0.000000e+00> : vector<8xf32>
    %93 = vector.multi_reduction <add>, %92, %cst_27 [1] : vector<8x8xf32> to vector<8xf32>
    %94 = vector.shape_cast %93 : vector<8xf32> to vector<8x1xf32>
    %95 = tpu.reciprocal %94 {approx = true} : vector<8x1xf32> -> vector<8x1xf32>
    %96 = vector.broadcast %95 : vector<8x1xf32> to vector<8x8xf32>
    %97 = arith.mulf %92, %96 : vector<8x8xf32>
    %cst_28 = arith.constant dense<0.000000e+00> : vector<8x16xf32>
    %98 = tpu.matmul %97, %86, %cst_28 {dimension_numbers = #tpu.dot_dimension_numbers<[1], [0], [0], [1], [0, 0, 1, 1], [], []>} : vector<8x8xf32>, vector<8x16xf32>, vector<8x16xf32> -> vector<8x16xf32>
    %99 = tpu.concatenate %53, %68, %83, %98 in 1 : vector<8x16xf32>, vector<8x16xf32>, vector<8x16xf32>, vector<8x16xf32> -> vector<8x64xf32>
    %100 = arith.truncf %99 : vector<8x64xf32> to vector<8x64xbf16>
    %c0_29 = arith.constant 0 : index
    %c0_30 = arith.constant 0 : index
    %c0_31 = arith.constant 0 : index
    %101 = vector.load %arg3[%c0_29, %c0_30, %c0_31] : memref<1x64x32xbf16, #tpu.memory_space<vmem>>, vector<1x64x32xbf16>
    %102 = vector.shape_cast %101 : vector<1x64x32xbf16> to vector<64x32xbf16>
    %cst_32 = arith.constant dense<0.000000e+00> : vector<8x32xf32>
    %103 = tpu.matmul %100, %102, %cst_32 {dimension_numbers = #tpu.dot_dimension_numbers<[1], [0], [0], [1], [0, 0, 1, 1], [], []>} : vector<8x64xbf16>, vector<64x32xbf16>, vector<8x32xf32> -> vector<8x32xf32>
    %104 = vector.broadcast %8 : vector<1x32xf32> to vector<8x32xf32>
    %105 = arith.addf %103, %104 : vector<8x32xf32>
    %106 = arith.addf %3, %105 : vector<8x32xf32>
    %cst_33 = arith.constant dense<0.000000e+00> : vector<8xf32>
    %107 = vector.multi_reduction <add>, %106, %cst_33 [1] : vector<8x32xf32> to vector<8xf32>
    %108 = vector.shape_cast %107 : vector<8xf32> to vector<8x1xf32>
    %cst_34 = arith.constant 3.200000e+01 : f32
    %109 = vector.broadcast %cst_34 : f32 to vector<8x1xf32>
    %110 = arith.divf %108, %109 : vector<8x1xf32>
    %111 = vector.broadcast %110 : vector<8x1xf32> to vector<8x32xf32>
    %112 = arith.subf %106, %111 : vector<8x32xf32>
    %113 = arith.mulf %112, %112 : vector<8x32xf32>
    %cst_35 = arith.constant dense<0.000000e+00> : vector<8xf32>
    %114 = vector.multi_reduction <add>, %113, %cst_35 [1] : vector<8x32xf32> to vector<8xf32>
    %115 = vector.shape_cast %114 : vector<8xf32> to vector<8x1xf32>
    %cst_36 = arith.constant 3.200000e+01 : f32
    %116 = vector.broadcast %cst_36 : f32 to vector<8x1xf32>
    %117 = arith.divf %115, %116 : vector<8x1xf32>
    %118 = vector.broadcast %110 : vector<8x1xf32> to vector<8x32xf32>
    %119 = arith.subf %106, %118 : vector<8x32xf32>
    %cst_37 = arith.constant 9.99999974E-6 : f32
    %120 = vector.broadcast %cst_37 : f32 to vector<8x1xf32>
    %121 = arith.addf %117, %120 : vector<8x1xf32>
    %122 = math.rsqrt %121 : vector<8x1xf32>
    %123 = vector.broadcast %122 : vector<8x1xf32> to vector<8x32xf32>
    %124 = arith.mulf %119, %123 : vector<8x32xf32>
    %125 = vector.broadcast %9 : vector<1x32xf32> to vector<8x32xf32>
    %126 = arith.mulf %124, %125 : vector<8x32xf32>
    %127 = vector.broadcast %10 : vector<1x32xf32> to vector<8x32xf32>
    %128 = arith.addf %126, %127 : vector<8x32xf32>
    %129 = arith.truncf %128 : vector<8x32xf32> to vector<8x32xbf16>
    %c0_38 = arith.constant 0 : index
    %c0_39 = arith.constant 0 : index
    %c0_40 = arith.constant 0 : index
    %130 = vector.load %arg4[%c0_38, %c0_39, %c0_40] : memref<1x32x64xbf16, #tpu.memory_space<vmem>>, vector<1x32x64xbf16>
    %131 = vector.shape_cast %130 : vector<1x32x64xbf16> to vector<32x64xbf16>
    %cst_41 = arith.constant dense<0.000000e+00> : vector<8x64xf32>
    %132 = tpu.matmul %129, %131, %cst_41 {dimension_numbers = #tpu.dot_dimension_numbers<[1], [0], [0], [1], [0, 0, 1, 1], [], []>} : vector<8x32xbf16>, vector<32x64xbf16>, vector<8x64xf32> -> vector<8x64xf32>
    %133 = vector.broadcast %11 : vector<1x64xf32> to vector<8x64xf32>
    %134 = arith.addf %132, %133 : vector<8x64xf32>
    %cst_42 = arith.constant 5.000000e-01 : f32
    %135 = vector.broadcast %cst_42 : f32 to vector<8x64xf32>
    %136 = arith.mulf %135, %134 : vector<8x64xf32>
    %cst_43 = arith.constant 0.707106769 : f32
    %137 = vector.broadcast %cst_43 : f32 to vector<8x64xf32>
    %138 = arith.mulf %134, %137 : vector<8x64xf32>
    %139 = math.erf %138 : vector<8x64xf32>
    %cst_44 = arith.constant 1.000000e+00 : f32
    %140 = vector.broadcast %cst_44 : f32 to vector<8x64xf32>
    %141 = arith.addf %140, %139 : vector<8x64xf32>
    %142 = arith.mulf %136, %141 : vector<8x64xf32>
    %143 = arith.truncf %142 : vector<8x64xf32> to vector<8x64xbf16>
    %c0_45 = arith.constant 0 : index
    %c0_46 = arith.constant 0 : index
    %c0_47 = arith.constant 0 : index
    %144 = vector.load %arg5[%c0_45, %c0_46, %c0_47] : memref<1x64x32xbf16, #tpu.memory_space<vmem>>, vector<1x64x32xbf16>
    %145 = vector.shape_cast %144 : vector<1x64x32xbf16> to vector<64x32xbf16>
    %cst_48 = arith.constant dense<0.000000e+00> : vector<8x32xf32>
    %146 = tpu.matmul %143, %145, %cst_48 {dimension_numbers = #tpu.dot_dimension_numbers<[1], [0], [0], [1], [0, 0, 1, 1], [], []>} : vector<8x64xbf16>, vector<64x32xbf16>, vector<8x32xf32> -> vector<8x32xf32>
    %147 = vector.broadcast %12 : vector<1x32xf32> to vector<8x32xf32>
    %148 = arith.addf %146, %147 : vector<8x32xf32>
    %149 = arith.addf %106, %148 : vector<8x32xf32>
    %c0_49 = arith.constant 0 : index
    %c0_50 = arith.constant 0 : index
    %150 = vector.load %arg12[%c0_49, %c0_50] : memref<8x32xf32, #tpu.memory_space<vmem>>, vector<8x32xf32>
    tpu.vector_store %arg12[%c0_49, %c0_50], %149 {strides = array<i32>} : memref<8x32xf32, #tpu.memory_space<vmem>>, vector<8x32xf32>,
    %c1_i32 = arith.constant 1 : i32
    %151 = arith.cmpi eq, %arg0, %c1_i32 : i32
    %152 = arith.extui %151 : i1 to i32
    %c0_i32_51 = arith.constant 0 : i32
    %153 = arith.cmpi ne, %152, %c0_i32_51 : i32
    scf.if %153 {
      %c0_52 = arith.constant 0 : index
      %c0_53 = arith.constant 0 : index
      %154 = vector.load %arg7[%c0_52, %c0_53] : memref<8x128xf32, #tpu.memory_space<vmem>>, vector<8x128xf32>
      %155 = vector.extract_strided_slice %154 {offsets = [0, 0], sizes = [1, 32], strides = [1, 1]} : vector<8x128xf32> to vector<1x32xf32>
      %156 = vector.extract_strided_slice %154 {offsets = [1, 0], sizes = [1, 32], strides = [1, 1]} : vector<8x128xf32> to vector<1x32xf32>
      %157 = vector.extract_strided_slice %154 {offsets = [2, 0], sizes = [1, 16], strides = [1, 1]} : vector<8x128xf32> to vector<1x16xf32>
      %158 = vector.extract_strided_slice %154 {offsets = [3, 0], sizes = [1, 4], strides = [1, 1]} : vector<8x128xf32> to vector<1x4xf32>
      %159 = vector.extract_strided_slice %149 {offsets = [0, 0], sizes = [1, 32], strides = [1, 1]} : vector<8x32xf32> to vector<1x32xf32>
      %cst_54 = arith.constant dense<0.000000e+00> : vector<1xf32>
      %160 = vector.multi_reduction <add>, %159, %cst_54 [1] : vector<1x32xf32> to vector<1xf32>
      %161 = vector.shape_cast %160 : vector<1xf32> to vector<1x1xf32>
      %cst_55 = arith.constant 3.200000e+01 : f32
      %162 = vector.broadcast %cst_55 : f32 to vector<1x1xf32>
      %163 = arith.divf %161, %162 : vector<1x1xf32>
      %164 = vector.broadcast %163 : vector<1x1xf32> to vector<1x32xf32>
      %165 = arith.subf %159, %164 : vector<1x32xf32>
      %166 = arith.mulf %165, %165 : vector<1x32xf32>
      %cst_56 = arith.constant dense<0.000000e+00> : vector<1xf32>
      %167 = vector.multi_reduction <add>, %166, %cst_56 [1] : vector<1x32xf32> to vector<1xf32>
      %168 = vector.shape_cast %167 : vector<1xf32> to vector<1x1xf32>
      %cst_57 = arith.constant 3.200000e+01 : f32
      %169 = vector.broadcast %cst_57 : f32 to vector<1x1xf32>
      %170 = arith.divf %168, %169 : vector<1x1xf32>
      %171 = vector.broadcast %163 : vector<1x1xf32> to vector<1x32xf32>
      %172 = arith.subf %159, %171 : vector<1x32xf32>
      %cst_58 = arith.constant 9.99999974E-6 : f32
      %173 = vector.broadcast %cst_58 : f32 to vector<1x1xf32>
      %174 = arith.addf %170, %173 : vector<1x1xf32>
      %175 = math.rsqrt %174 : vector<1x1xf32>
      %176 = vector.broadcast %175 : vector<1x1xf32> to vector<1x32xf32>
      %177 = arith.mulf %172, %176 : vector<1x32xf32>
      %178 = arith.mulf %177, %155 : vector<1x32xf32>
      %179 = arith.addf %178, %156 : vector<1x32xf32>
      %c0_59 = arith.constant 0 : index
      %c0_60 = arith.constant 0 : index
      %180 = vector.load %arg8[%c0_59, %c0_60] : memref<32x16xf32, #tpu.memory_space<vmem>>, vector<32x16xf32>
      %cst_61 = arith.constant dense<0.000000e+00> : vector<1x16xf32>
      %181 = tpu.matmul %179, %180, %cst_61 {dimension_numbers = #tpu.dot_dimension_numbers<[1], [0], [0], [1], [0, 0, 1, 1], [], []>} : vector<1x32xf32>, vector<32x16xf32>, vector<1x16xf32> -> vector<1x16xf32>
      %182 = arith.addf %181, %157 : vector<1x16xf32>
      %c0_62 = arith.constant 0 : index
      %c0_63 = arith.constant 0 : index
      %183 = vector.load %arg9[%c0_62, %c0_63] : memref<16x4xf32, #tpu.memory_space<vmem>>, vector<16x4xf32>
      %cst_64 = arith.constant dense<0.000000e+00> : vector<1x4xf32>
      %184 = tpu.matmul %182, %183, %cst_64 {dimension_numbers = #tpu.dot_dimension_numbers<[1], [0], [0], [1], [0, 0, 1, 1], [], []>} : vector<1x16xf32>, vector<16x4xf32>, vector<1x4xf32> -> vector<1x4xf32>
      %185 = arith.addf %184, %158 : vector<1x4xf32>
      %c0_65 = arith.constant 0 : index
      %c0_66 = arith.constant 0 : index
      %186 = vector.load %arg11[%c0_65, %c0_66] : memref<1x16xf32, #tpu.memory_space<vmem>>, vector<1x16xf32>
      tpu.vector_store %arg11[%c0_65, %c0_66], %182 {strides = array<i32>} : memref<1x16xf32, #tpu.memory_space<vmem>>, vector<1x16xf32>,
      %c0_67 = arith.constant 0 : index
      %c0_68 = arith.constant 0 : index
      %187 = vector.load %arg10[%c0_67, %c0_68] : memref<1x4xf32, #tpu.memory_space<vmem>>, vector<1x4xf32>
      tpu.vector_store %arg10[%c0_67, %c0_68], %185 {strides = array<i32>} : memref<1x4xf32, #tpu.memory_space<vmem>>, vector<1x4xf32>,
    } else {
    }
    return
  }
  func.func @transform_0(%arg0: i32) -> (i32, i32) {
    %c0_i32 = arith.constant 0 : i32
    %c0_i32_0 = arith.constant 0 : i32
    %c0_i32_1 = arith.constant 0 : i32
    return %c0_i32, %c0_i32_0 : i32, i32
  }
  func.func @transform_1(%arg0: i32) -> (i32, i32, i32) {
    %c0_i32 = arith.constant 0 : i32
    %c0_i32_0 = arith.constant 0 : i32
    %c0_i32_1 = arith.constant 0 : i32
    return %arg0, %c0_i32, %c0_i32_0 : i32, i32, i32
  }
  func.func @transform_2(%arg0: i32) -> (i32, i32, i32) {
    %c0_i32 = arith.constant 0 : i32
    %c0_i32_0 = arith.constant 0 : i32
    %c0_i32_1 = arith.constant 0 : i32
    return %arg0, %c0_i32, %c0_i32_0 : i32, i32, i32
  }
  func.func @transform_3(%arg0: i32) -> (i32, i32, i32) {
    %c0_i32 = arith.constant 0 : i32
    %c0_i32_0 = arith.constant 0 : i32
    %c0_i32_1 = arith.constant 0 : i32
    return %arg0, %c0_i32, %c0_i32_0 : i32, i32, i32
  }
  func.func @transform_4(%arg0: i32) -> (i32, i32, i32) {
    %c0_i32 = arith.constant 0 : i32
    %c0_i32_0 = arith.constant 0 : i32
    %c0_i32_1 = arith.constant 0 : i32
    return %arg0, %c0_i32, %c0_i32_0 : i32, i32, i32
  }
  func.func @transform_5(%arg0: i32) -> (i32, i32, i32) {
    %c0_i32 = arith.constant 0 : i32
    %c0_i32_0 = arith.constant 0 : i32
    %c0_i32_1 = arith.constant 0 : i32
    return %arg0, %c0_i32, %c0_i32_0 : i32, i32, i32
  }
  func.func @transform_6(%arg0: i32) -> (i32, i32) {
    %c0_i32 = arith.constant 0 : i32
    %c0_i32_0 = arith.constant 0 : i32
    %c0_i32_1 = arith.constant 0 : i32
    return %c0_i32, %c0_i32_0 : i32, i32
  }
  func.func @transform_7(%arg0: i32) -> (i32, i32) {
    %c0_i32 = arith.constant 0 : i32
    %c0_i32_0 = arith.constant 0 : i32
    %c0_i32_1 = arith.constant 0 : i32
    return %c0_i32, %c0_i32_0 : i32, i32
  }
  func.func @transform_8(%arg0: i32) -> (i32, i32) {
    %c0_i32 = arith.constant 0 : i32
    %c0_i32_0 = arith.constant 0 : i32
    %c0_i32_1 = arith.constant 0 : i32
    return %c0_i32, %c0_i32_0 : i32, i32
  }
  func.func @transform_9(%arg0: i32) -> (i32, i32) {
    %c0_i32 = arith.constant 0 : i32
    %c0_i32_0 = arith.constant 0 : i32
    %c0_i32_1 = arith.constant 0 : i32
    return %c0_i32, %c0_i32_0 : i32, i32
  }
  func.func @transform_10(%arg0: i32) -> (i32, i32) {
    %c0_i32 = arith.constant 0 : i32
    %c0_i32_0 = arith.constant 0 : i32
    %c0_i32_1 = arith.constant 0 : i32
    return %c0_i32, %c0_i32_0 : i32, i32
  }
}

</mosaic_0001>

<bundles_post_ra>
// kernel: tpu_custom_call.1
= control target key start
LH: loop header
LB: loop body
LE: loop exit
PB: predicated region body
PF: predicated region fallthrough
CT: control target
= control target key end

     0   :  { %16 = vsyncpa [#allocation4], 0  ;;  %s1710_s0 = inlined_call_operand.vmem [shape: f32[8,32], index: 0, kind: input, shape index: {}]   ;;  %s1711_s1 = inlined_call_operand.vmem [shape: bf16[2,32,192], index: 1, kind: input, shape index: {}]   ;;  %s1712_s2 = inlined_call_operand.vmem [shape: bf16[2,64,32], index: 2, kind: input, shape index: {}]   ;;  %s1713_s3 = inlined_call_operand.vmem [shape: bf16[2,32,64], index: 3, kind: input, shape index: {}]   ;;  %s1714_s4 = inlined_call_operand.vmem [shape: bf16[2,64,32], index: 4, kind: input, shape index: {}]   ;;  %s1715_s5 = inlined_call_operand.vmem [shape: f32[2,8,128], index: 5, kind: input, shape index: {}]   ;;  %s1716_s6 = inlined_call_operand.vmem [shape: f32[8,128], index: 6, kind: input, shape index: {}]   ;;  %s1717_s7 = inlined_call_operand.vmem [shape: f32[32,16], index: 7, kind: input, shape index: {}]   ;;  %s1718_s8 = inlined_call_operand.vmem [shape: f32[16,4], index: 8, kind: input, shape index: {}]   ;;  %s1719_s9 = inlined_call_operand.hbm [shape: f32[1,4], index: 9, kind: output, shape index: {0}]   ;;  %s1720_s10 = inlined_call_operand.hbm [shape: f32[1,16], index: 10, kind: output, shape index: {1}]  }
   0x1   :  { %17 = vsyncpa [#allocation6], 0  ;;  %s1524_s13 = smov 0  }
   0x2 LB: > { %s1530_s14 = sadd.s32 4294967295, %s1457_s13   ;;  %p1219_p0 = scmp.ge.s32.totalorder %s1457_s13, 1  ;;  %s1457_s13 = sphi %s1524_s13, %s23_s13  }
   0x3   : > { %p346_p1 = scmp.lt.s32.totalorder %s1457_s13, 3 }
   0x5   : > { %p347_p2 = pnand %p1219_p0, %p346_p1 }
   0x6   : > { %p398_p3 = scmp.lt.s32.totalorder (!%p347_p2), %s1530_s14, 1  ;;  %p1229_p4 = scmp.ne.s32.totalorder (!%p347_p2), %s1530_s14, 0 }
   0x7   : > { %350 = sbr.rel (%p347_p2) target bundleno = 2872 (0xb38), region = 56 }
   0xc   : > { %s399_s15 = scalar_select %p398_p3, %s1530_s14, 1 }
   0xe   : > { %s1313_s16 = sshll.u32 %s399_s15, 5  ;;  %s1315_s17 = sshll.u32 %s399_s15, 4 }
   0xf   : > { %s1539_s20 = scalar_lea.vmem %s1711_s1, %s1313_s16  ;;  %s1544_s23 = scalar_lea.vmem %s1712_s2, %s1313_s16 }
  0x10   : > { %s1549_s26 = scalar_lea.vmem %s1713_s3, %s1315_s17  ;;  %s1554_s29 = scalar_lea.vmem %s1714_s4, %s1313_s16 }
  0x11   : > { %s1228_s30 = sshll.u32 %s399_s15, 3  ;;  %426 = sbr.rel (%p1229_p4) target bundleno = 24 (0x18), region = 60 }
  0x12   : > { %s1559_s18 = scalar_lea.vmem %s1715_s5, %s1228_s30 }
  0x16   : > { %v427_v0 = vld [vmem:[%s1710_s0] sm:$0xff]  ;;  %vm428_vm0 = vcmask 261120  }
  0x17   : > { %429 = vst.msk [vmem:[#allocation2] sm:$0xff] %vm428_vm0, %v427_v0 }
  0x18 PF: > { %vm432_vm1 = vcmask 261120   ;;  %v1459_v3 = vmov 32.0   ;;  %v1240_v15 = vld [vmem:[%s1539_s20 + $0x10] sm:$0xf]  ;;  %v1320_v16 = vld [vmem:[%s1539_s20 + $0x14] sm:$0xf0] }
  0x19   : > { %1361 = vrcp.f32 %v1459_v3  ;;  %v1319_v17 = vld [vmem:[%s1539_s20 + $0x14] sm:$0xf]  ;;  %v1241_v18 = vor.u32 %v1320_v16, %v1240_v15  ;;  %v1242_v19 = vld [vmem:[%s1539_s20 + $0x18] sm:$0xf0]  ;;  %v1232_v20 = vld [vmem:[%s1539_s20] sm:$0xf] }
  0x1a   : > { %v1318_v21 = vld [vmem:[%s1539_s20 + $0x4] sm:$0xf0]  ;;  %v1245_v22 = vor.u32 %v1319_v17, %v1242_v19  ;;  %v1317_v23 = vld [vmem:[%s1539_s20 + $0x4] sm:$0xf]  ;;  %v1234_v24 = vld [vmem:[%s1539_s20 + $0x8] sm:$0xf0] }
  0x1b   : > { %500 = vmatpush.bf16.msra.mxu0 %v1241_v18  ;;  %v1233_v25 = vor.u32 %v1318_v21, %v1232_v20  ;;  %v1237_v26 = vor.u32 %v1317_v23, %v1234_v24  ;;  %v1584_v35 = vld [vmem:[%s1559_s18] sm:$0xff]  ;;  %s1460_s15 = smov 112   ;;  %s1461_s16 = smov 48   ;;  %vm523_vm6 = vcmask 130048   ;;  %vm548_vm7 = vcmask 64512  }
  0x1c   : > { %513 = vmatpush.bf16.msra.mxu1 %v1245_v22  ;;  %v462_v37 = vperm.slane %v1584_v35, 0  ;;  %v464_v40 = vperm.slane %v1584_v35, 1  ;;  %s1462_s17 = smov 64   ;;  %s1463_s20 = smov 96   ;;  %vm793_vm8 = vcmask 392192   ;;  %vm829_vm9 = vcmask 523264  }
  0x1d   : > { %s1464_s22 = smov 32   ;;  %s1465_s24 = smov 80  }
  0x1e   : > { %v1565_v1 = vld [vmem:[#allocation2] sm:$0xff]  ;;  %s1466_s25 = smov 16   ;;  %p1304_p5 = scmp.ne.s32.totalorder %s1530_s14, 1 }
  0x1f   : > { %v433_v2 = vsel %vm432_vm1, %v1565_v1, 0.0  ;;  %v1362_v4 = vpop.eup %1361  ;;  %501 = vmatpush.bf16.msra.mxu0 %v1233_v25 }
  0x20   : > { %434 = vadd.xlane.f32.xlu0 %v433_v2  ;;  %v437_v5 = vmul.f32 32.0, %v1362_v4  ;;  %vm441_vm2 = vweird.f32 %v1362_v4  ;;  %514 = vmatpush.bf16.msra.mxu1 %v1237_v26 }
  0x22   : > { %v438_v6 = vsub.f32 1.0, %v437_v5 }
  0x24   : > { %v439_v7 = vmul.f32 %v1362_v4, %v438_v6 }
  0x26   : > { %v440_v8 = vadd.f32 %v1362_v4, %v439_v7 }
  0x28   : > { %v1569_v9 = vsel %vm441_vm2, %v1362_v4, %v440_v8 }
  0x93   : > { %v435_v10 = vpop.xlane.xlu0 %434 }
  0x94   : > { %v443_v11 = vmul.f32 %v1569_v9, %v435_v10 }
  0x96   : > { %v444_v12 = vsub.f32 %v1565_v1, %v443_v11 }
  0x98   : > { %v445_v13 = vmul.f32 %v444_v12, %v444_v12 }
  0x9a   : > { %v446_v14 = vsel %vm432_vm1, %v445_v13, 0.0 }
  0x9b   : > { %447 = vadd.xlane.f32.xlu0 %v446_v14 }
 0x10e   : > { %v448_v27 = vpop.xlane.xlu0 %447 }
 0x10f   : > { %v449_v28 = vmul.f32 %v448_v27, %v1569_v9 }
 0x111   : > { %v450_v29 = vadd.f32 1e-05, %v449_v28 }
 0x113   : > { %1363 = vrsqrt.f32 %v450_v29  ;;  %vm457_vm4 = vweird.f32 %v450_v29 }
 0x119   : > { %v1364_v30 = vpop.eup %1363 }
 0x11a   : > { %v452_v31 = vmul.f32 %v1364_v30, %v450_v29  ;;  %vm458_vm3 = vweird.f32 %v1364_v30 }
 0x11b   : > { %vm459_vm5 = vmor %vm457_vm4, %vm458_vm3 }
 0x11c   : > { %v453_v32 = vmul.f32 %v1364_v30, %v452_v31 }
 0x11e   : > { %v454_v33 = vmul.f32 0.5, %v453_v32 }
 0x120   : > { %v455_v34 = vsub.f32 1.5, %v454_v33 }
 0x122   : > { %v456_v36 = vmul.f32 %v1364_v30, %v455_v34 }
 0x124   : > { %v460_v38 = vsel %vm459_vm5, %v1364_v30, %v456_v36 }
 0x125   : > { %v461_v39 = vmul.f32 %v460_v38, %v444_v12 }
 0x127   : > { %v463_v41 = vmul.f32 %v462_v37, %v461_v39 }
 0x129   : > { %v465_v42 = vadd.f32 %v464_v40, %v463_v41  ;;  %v1324_v41 = vld [vmem:[%s1544_s23 + $0x18] sm:$0xff] }
 0x12b   : > { %v466_v43 = vpack.c.bf16 %v465_v42, %v465_v42  ;;  %v1323_v42 = vld [vmem:[%s1544_s23 + $0x10] sm:$0xff] }
 0x12d   : > { %1246 = vmatmul.msk.bf16.vlgmr.msra.gmra.mxu0 %vm432_vm1, %v466_v43  ;;  %1247 = vmatmul.msk.bf16.vlgmr.msra.gmra.mxu1 %vm432_vm1, %v466_v43  ;;  %v1322_v43 = vld [vmem:[%s1544_s23 + $0x8] sm:$0xff] }
 0x1aa   : > { %v503_v44 = vpop.f32.mrf.mxu0  ;;  %v1590_v45 = vpop.f32.mrf.mxu1 }
 0x1ab   : > { %578 = vmatpush.msra.mxu3 %v1590_v45  ;;  %583 = vrot.lane.b32.xlu0 %v503_v44, %s1460_s15 }
 0x1ac   : > { %585 = vrot.lane.b32.xlu2 %v503_v44, %s1461_s16  ;;  %521 = vrot.lane.b32.xlu1 %v503_v44, %s1462_s17 }
 0x1b2   : > { %v505_v46 = vpop.f32.mrf.mxu0  ;;  %v518_v47 = vpop.f32.mrf.mxu1 }
 0x1b3   : > { %649 = vrot.lane.b32.xlu0 %v503_v44, %s1463_s20 }
 0x1b4   : > { %651 = vrot.lane.b32.xlu2 %v503_v44, %s1464_s22 }
 0x1bb   : > { %714 = vrot.lane.b32.xlu0 %v503_v44, %s1465_s24 }
 0x206   : > { %v586_v48 = vpop.permute.xlu2 %585 }
 0x207   : > { %1251 = vmatpush.xpose.msk.msrb.mxu3 %vm523_vm6, %v586_v48 }
 0x20e   : > { %v652_v58 = vpop.permute.xlu2 %651 }
 0x21d   : > { %v584_v57 = vpop.permute.xlu0 %583 }
 0x21e   : > { %v522_v49 = vpop.permute.xlu1 %521 }
 0x21f   : > { %1248 = vmatpush.xpose.msk.msra.mxu2 %vm523_vm6, %v522_v49 }
 0x222   : > { %1249 = vmatmul.msk.f32.vlgmr.msra.gmra.mxu2 %vm523_vm6, %v503_v44 }
 0x225   : > { %v650_v60 = vpop.permute.xlu0 %649 }
 0x22d   : > { %v715_v0 = vpop.permute.xlu0 %714 }
 0x2a5   : > { %v545_v50 = vpop.f32.mrf.mxu2 }
 0x2a6   : > { %v549_v51 = vsel %vm548_vm7, %v545_v50, -inf }
 0x2a7   : > { %550 = vmax.xlane.f32.xlu1 %v549_v51 }
 0x31a   : > { %v551_v52 = vpop.xlane.xlu1 %550 }
 0x31b   : > { %v552_v53 = vsub.f32 %v545_v50, %v551_v52  ;;  %v804_v52 = vperm.slane %v1584_v35, 2 }
 0x31d   : > { %v553_v54 = vmul.f32 1.442695, %v552_v53 }
 0x31f   : > { %1365 = vpow2.f32 %v553_v54 }
 0x325   : > { %v1366_v55 = vpop.eup %1365 }
 0x326   : > { %v555_v56 = vsel %vm548_vm7, %v1366_v55, 0.0 }
 0x327   : > { %556 = vadd.xlane.f32.xlu2 %v555_v56 }
 0x33f   : > { %716 = vrot.lane.b32.xlu2 %v503_v44, %s1466_s25  ;;  %v1321_v44 = vld [vmem:[%s1544_s23] sm:$0xff] }
 0x39a   : > { %v557_v59 = vpop.xlane.xlu2 %556 }
 0x39b   : > { %1367 = vrcp.f32 %v557_v59 }
 0x3a1   : > { %v1368_v61 = vpop.eup %1367 }
 0x3a2   : > { %v717_v62 = vpop.permute.xlu2 %716  ;;  %v559_v63 = vmul.f32 %v1368_v61, %v1366_v55 }
 0x3a3   : > { %1257 = vmatpush.xpose.msk.msrb.mxu1 %vm523_vm6, %v717_v62 }
 0x3a4   : > { %1250 = vmatmul.msk.f32.vlgmr.msra.gmra.mxu3 %vm548_vm7, %v559_v63  ;;  %v1326_v63 = vld [vmem:[%s1549_s26 + $0x8] sm:$0xff] }
 0x3a5   : > { %1254 = vmatpush.xpose.msk.msra.mxu3 %vm523_vm6, %v652_v58 }
 0x3a6   : > { %1258 = vmatmul.msk.f32.vlgmr.msrb.gmra.mxu1 %vm523_vm6, %v715_v0  ;;  %v1325_v0 = vld [vmem:[%s1549_s26] sm:$0xff] }
 0x3ac   : > { %1252 = vmatmul.msk.f32.vlgmr.msrb.gmra.mxu3 %vm523_vm6, %v584_v57 }
 0x3ad   : > { %837 = vmatpush.bf16.msrb.mxu3 %v1324_v41 }
 0x3b1   : > { %838 = vmatpush.bf16.msrb.mxu3 %v1323_v42 }
 0x3b4   : > { %1255 = vmatmul.msk.f32.vlgmr.msra.gmra.mxu3 %vm523_vm6, %v650_v60 }
 0x3b5   : > { %839 = vmatpush.bf16.msrb.mxu3 %v1322_v43 }
 0x3b9   : > { %840 = vmatpush.bf16.msrb.mxu3 %v1321_v44 }
 0x423   : > { %v739_v2 = vpop.f32.mrf.mxu1 }
 0x424   : > { %v742_v3 = vsel %vm548_vm7, %v739_v2, -inf }
 0x425   : > { %743 = vmax.xlane.f32.xlu0 %v742_v3 }
 0x427   : > { %v1611_v4 = vpop.f32.mrf.mxu3 }
 0x42f   : > { %v608_v5 = vpop.f32.mrf.mxu3 }
 0x430   : > { %v611_v6 = vsel %vm548_vm7, %v608_v5, -inf }
 0x431   : > { %612 = vmax.xlane.f32.xlu2 %v611_v6 }
 0x437   : > { %v674_v7 = vpop.f32.mrf.mxu3 }
 0x438   : > { %v677_v8 = vsel %vm548_vm7, %v674_v7, -inf }
 0x439   : > { %678 = vmax.xlane.f32.xlu1 %v677_v8  ;;  %688 = vrot.lane.b32.xlu0 %v1590_v45, %s1463_s20 }
 0x498   : > { %v744_v10 = vpop.xlane.xlu0 %743 }
 0x499   : > { %v745_v11 = vsub.f32 %v739_v2, %v744_v10 }
 0x49b   : > { %v746_v12 = vmul.f32 1.442695, %v745_v11  ;;  %v869_v11 = vperm.slane %v1584_v35, 3 }
 0x49d   : > { %1369 = vpow2.f32 %v746_v12 }
 0x4a3   : > { %v1370_v13 = vpop.eup %1369 }
 0x4a4   : > { %v613_v14 = vpop.xlane.xlu2 %612  ;;  %v748_v15 = vsel %vm548_vm7, %v1370_v13, 0.0 }
 0x4a5   : > { %v614_v16 = vsub.f32 %v608_v5, %v613_v14  ;;  %749 = vadd.xlane.f32.xlu2 %v748_v15  ;;  %v871_v14 = vperm.slane %v1584_v35, 4 }
 0x4a7   : > { %v615_v17 = vmul.f32 1.442695, %v614_v16 }
 0x4a9   : > { %1371 = vpow2.f32 %v615_v17 }
 0x4ab   : > { %v689_v34 = vpop.permute.xlu0 %688 }
 0x4ac   : > { %v679_v18 = vpop.xlane.xlu1 %678 }
 0x4ad   : > { %v680_v19 = vsub.f32 %v674_v7, %v679_v18  ;;  %v878_v18 = vperm.slane %v1584_v35, 5 }
 0x4af   : > { %v1372_v20 = vpop.eup %1371  ;;  %v681_v21 = vmul.f32 1.442695, %v680_v19 }
 0x4b0   : > { %v617_v22 = vsel %vm548_vm7, %v1372_v20, 0.0 }
 0x4b1   : > { %1373 = vpow2.f32 %v681_v21  ;;  %618 = vadd.xlane.f32.xlu1 %v617_v22 }
 0x4b7   : > { %v1374_v23 = vpop.eup %1373 }
 0x4b8   : > { %v683_v24 = vsel %vm548_vm7, %v1374_v23, 0.0 }
 0x4b9   : > { %684 = vadd.xlane.f32.xlu1 %v683_v24 }
 0x4bd   : > { %753 = vrot.lane.b32.xlu2 %v1590_v45, %s1465_s24 }
 0x4d2   : > { %623 = vrot.lane.b32.xlu1 %v1590_v45, %s1460_s15 }
 0x518   : > { %v750_v25 = vpop.xlane.xlu2 %749 }
 0x519   : > { %1375 = vrcp.f32 %v750_v25  ;;  %v1330_v25 = vld [vmem:[%s1554_s29 + $0x18] sm:$0xff] }
 0x51a   : > { %992 = vmatpush.bf16.msrb.mxu0 %v1330_v25 }
 0x51f   : > { %v1376_v26 = vpop.eup %1375 }
 0x520   : > { %v752_v27 = vmul.f32 %v1376_v26, %v1370_v13  ;;  %v754_v28 = vpop.permute.xlu2 %753 }
 0x521   : > { %774 = vmatpush.msra.mxu1 %v754_v28 }
 0x522   : > { %1259 = vmatmul.msk.f32.vlgmr.msra.gmra.mxu1 %vm548_vm7, %v752_v27 }
 0x524   : > { %v619_v29 = vpop.xlane.xlu1 %618 }
 0x525   : > { %1377 = vrcp.f32 %v619_v29 }
 0x52b   : > { %v1378_v31 = vpop.eup %1377 }
 0x52c   : > { %v685_v30 = vpop.xlane.xlu1 %684  ;;  %v621_v33 = vmul.f32 %v1378_v31, %v1372_v20 }
 0x52d   : > { %1379 = vrcp.f32 %v685_v30  ;;  %v1329_v30 = vld [vmem:[%s1554_s29 + $0x10] sm:$0xff] }
 0x52e   : > { %993 = vmatpush.bf16.msrb.mxu0 %v1329_v30 }
 0x533   : > { %v1380_v36 = vpop.eup %1379 }
 0x534   : > { %v687_v37 = vmul.f32 %v1380_v36, %v1374_v23  ;;  %v1328_v36 = vld [vmem:[%s1554_s29 + $0x8] sm:$0xff] }
 0x535   : > { %994 = vmatpush.bf16.msrb.mxu0 %v1328_v36 }
 0x544   : > { %v624_v32 = vpop.permute.xlu1 %623 }
 0x545   : > { %644 = vmatpush.msrb.mxu2 %v624_v32 }
 0x546   : > { %1253 = vmatmul.msk.f32.vlgmr.msrb.gmra.mxu2 %vm548_vm7, %v621_v33 }
 0x547   : > { %709 = vmatpush.msra.mxu2 %v689_v34 }
 0x549   : > { %900 = vmatpush.bf16.msrb.mxu2 %v1326_v63 }
 0x54d   : > { %901 = vmatpush.bf16.msrb.mxu2 %v1325_v0 }
 0x54e   : > { %1256 = vmatmul.msk.f32.vlgmr.msra.gmra.mxu2 %vm548_vm7, %v687_v37 }
 0x59f   : > { %v776_v38 = vpop.f32.mrf.mxu1 }
 0x5a0   : > { %788 = vrot.lane.b32.xlu0 %v776_v38, %s1461_s16 }
 0x5c9   : > { %v646_v39 = vpop.f32.mrf.mxu2 }
 0x5ca   : > { %780 = vrot.lane.b32.xlu1 %v646_v39, %s1466_s25 }
 0x5d1   : > { %v711_v40 = vpop.f32.mrf.mxu2 }
 0x5d2   : > { %784 = vrot.lane.b32.xlu1 %v711_v40, %s1464_s22  ;;  %v1327_v40 = vld [vmem:[%s1554_s29] sm:$0xff] }
 0x5d3   : > { %995 = vmatpush.bf16.msrb.mxu0 %v1327_v40 }
 0x612   : > { %v789_v48 = vpop.permute.xlu0 %788 }
 0x63c   : > { %v781_v45 = vpop.permute.xlu1 %780 }
 0x63d   : > { %v791_v46 = vsel %vm523_vm6, %v1611_v4, %v781_v45 }
 0x644   : > { %v785_v47 = vpop.permute.xlu1 %784 }
 0x645   : > { %v792_v49 = vsel %vm432_vm1, %v791_v46, %v785_v47 }
 0x646   : > { %v794_v50 = vsel %vm793_vm8, %v792_v49, %v789_v48 }
 0x647   : > { %v795_v51 = vpack.c.bf16 %v794_v50, %v794_v50 }
 0x649   : > { %1276 = vmatmul.msk.bf16.vlgmr.msrb.gmra.mxu3 %vm829_vm9, %v795_v51 }
 0x6cc   : > { %v842_v53 = vpop.f32.mrf.mxu3 }
 0x6cd   : > { %v843_v54 = vadd.f32 %v842_v53, %v804_v52 }
 0x6cf   : > { %v1640_v55 = vadd.f32 %v843_v54, %v1565_v1 }
 0x6d1   : > { %v847_v56 = vsel %vm432_vm1, %v1640_v55, 0.0 }
 0x6d2   : > { %848 = vadd.xlane.f32.xlu1 %v847_v56 }
 0x6d4   : > { %v844_v57 = vpop.f32.mrf.mxu3 }
 0x745   : > { %v849_v58 = vpop.xlane.xlu1 %848 }
 0x746   : > { %v850_v59 = vmul.f32 %v849_v58, %v1569_v9 }
 0x748   : > { %v851_v60 = vsub.f32 %v1640_v55, %v850_v59 }
 0x74a   : > { %v852_v61 = vmul.f32 %v851_v60, %v851_v60 }
 0x74c   : > { %v853_v62 = vsel %vm432_vm1, %v852_v61, 0.0 }
 0x74d   : > { %854 = vadd.xlane.f32.xlu2 %v853_v62 }
 0x7c0   : > { %v855_v1 = vpop.xlane.xlu2 %854 }
 0x7c1   : > { %v856_v2 = vmul.f32 %v855_v1, %v1569_v9 }
 0x7c3   : > { %v857_v3 = vadd.f32 1e-05, %v856_v2 }
 0x7c5   : > { %1381 = vrsqrt.f32 %v857_v3  ;;  %vm864_vm11 = vweird.f32 %v857_v3 }
 0x7cb   : > { %v1382_v4 = vpop.eup %1381 }
 0x7cc   : > { %v859_v5 = vmul.f32 %v1382_v4, %v857_v3  ;;  %vm865_vm10 = vweird.f32 %v1382_v4 }
 0x7cd   : > { %vm866_vm12 = vmor %vm864_vm11, %vm865_vm10 }
 0x7ce   : > { %v860_v6 = vmul.f32 %v1382_v4, %v859_v5 }
 0x7d0   : > { %v861_v7 = vmul.f32 0.5, %v860_v6 }
 0x7d2   : > { %v862_v8 = vsub.f32 1.5, %v861_v7 }
 0x7d4   : > { %v863_v10 = vmul.f32 %v1382_v4, %v862_v8 }
 0x7d6   : > { %v867_v12 = vsel %vm866_vm12, %v1382_v4, %v863_v10  ;;  %v960_v4 = vperm.slane %v1584_v35, 6 }
 0x7d7   : > { %v868_v13 = vmul.f32 %v867_v12, %v851_v60 }
 0x7d9   : > { %v870_v15 = vmul.f32 %v869_v11, %v868_v13 }
 0x7db   : > { %v872_v16 = vadd.f32 %v871_v14, %v870_v15 }
 0x7dd   : > { %v873_v17 = vpack.c.bf16 %v872_v16, %v872_v16 }
 0x7df   : > { %1285 = vmatmul.msk.bf16.vlgmr.msrb.gmra.mxu2 %vm432_vm1, %v873_v17 }
 0x862   : > { %v903_v19 = vpop.f32.mrf.mxu2 }
 0x863   : > { %v904_v20 = vadd.f32 %v903_v19, %v878_v18 }
 0x865   : > { %v908_v21 = vmul.f32 0.70710677, %v904_v20  ;;  %v907_v0 = vmul.f32 0.5, %v904_v20 }
 0x867   : > { %v909_v22 = vmul.f32 %v908_v21, %v908_v21 }
 0x869   : > { %v910_v23 = vmin.f32 %v909_v22, 16.0 }
 0x86a   : > { %v905_v24 = vpop.f32.mrf.mxu2 }
 0x86b   : > { %v911_v26 = vmul.f32 2.1237322e-06, %v910_v23  ;;  %v922_v27 = vmul.f32 3.8918573e-05, %v910_v23 }
 0x86d   : > { %v912_v28 = vadd.f32 0.00028619796, %v911_v26  ;;  %v923_v29 = vadd.f32 0.001143296, %v922_v27 }
 0x86f   : > { %v913_v31 = vmul.f32 %v912_v28, %v910_v23  ;;  %v924_v32 = vmul.f32 %v923_v29, %v910_v23 }
 0x871   : > { %v925_v33 = vadd.f32 0.014752088, %v924_v32  ;;  %v914_v34 = vadd.f32 0.0036580483, %v913_v31 }
 0x873   : > { %v926_v37 = vmul.f32 %v925_v33, %v910_v23  ;;  %v915_v39 = vmul.f32 %v914_v34, %v910_v23 }
 0x875   : > { %v927_v38 = vadd.f32 0.112945676, %v926_v37  ;;  %v916_v43 = vadd.f32 0.05243302, %v915_v39 }
 0x877   : > { %v928_v41 = vmul.f32 %v927_v38, %v910_v23  ;;  %v917_v46 = vmul.f32 %v916_v43, %v910_v23 }
 0x879   : > { %v929_v42 = vadd.f32 0.4994258, %v928_v41  ;;  %v918_v47 = vadd.f32 0.18741608, %v917_v46 }
 0x87b   : > { %v930_v44 = vmul.f32 %v929_v42, %v910_v23  ;;  %v919_v49 = vmul.f32 %v918_v47, %v910_v23 }
 0x87d   : > { %v931_v45 = vadd.f32 1.0, %v930_v44  ;;  %v920_v53 = vadd.f32 1.1283791, %v919_v49 }
 0x87f   : > { %1383 = vrcp.f32 %v931_v45  ;;  %v943_v52 = vand.u32 2147483648, %v931_v45  ;;  %v941_v56 = vand.u32 2147483647, %v931_v45  ;;  %vm937_vm14 = vweird.f32 %v931_v45 }
 0x880   : > { %v921_v59 = vmul.f32 %v920_v53, %v908_v21 }
 0x881   : > { %v944_v58 = vor.u32 1.1754944e-38, %v943_v52  ;;  %vm942_vm0 = vcmp.eq.f32.partialorder %v941_v56, 8.507059e+37 }
 0x885   : > { %v1384_v48 = vpop.eup %1383 }
 0x886   : > { %v933_v50 = vmul.f32 %v1384_v48, %v931_v45  ;;  %vm938_vm13 = vweird.f32 %v1384_v48 }
 0x887   : > { %vm939_vm15 = vmor %vm937_vm14, %vm938_vm13 }
 0x888   : > { %v934_v51 = vsub.f32 1.0, %v933_v50 }
 0x88a   : > { %v935_v54 = vmul.f32 %v1384_v48, %v934_v51 }
 0x88c   : > { %v936_v57 = vadd.f32 %v1384_v48, %v935_v54 }
 0x88e   : > { %v940_v60 = vsel %vm939_vm15, %v1384_v48, %v936_v57 }
 0x88f   : > { %v945_v61 = vsel %vm942_vm0, %v944_v58, %v940_v60 }
 0x890   : > { %v946_v62 = vmul.f32 %v945_v61, %v921_v59 }
 0x892   : > { %v1286_v63 = vclamps-f32 %v946_v62, 1.0 }
 0x894   : > { %v949_v1 = vadd.f32 1.0, %v1286_v63 }
 0x896   : > { %v950_v2 = vmul.f32 %v949_v1, %v907_v0 }
 0x898   : > { %v951_v3 = vpack.c.bf16 %v950_v2, %v950_v2 }
 0x89a   : > { %1303 = vmatmul.msk.bf16.vlgmr.msrb.gmra.mxu0 %vm829_vm9, %v951_v3 }
 0x917   : > { %v997_v5 = vpop.f32.mrf.mxu0 }
 0x918   : > { %v998_v6 = vadd.f32 %v997_v5, %v960_v4 }
 0x91a   : > { %v1001_v7 = vadd.f32 %v998_v6, %v1640_v55 }
 0x91b   : > { %1006 = sbr.rel (%p1304_p5) target bundleno = 2862 (0xb2e), region = 64 }
 0x91c   : > { %1002 = vst.msk [vmem:[#allocation2] sm:$0xff] %vm432_vm1, %v1001_v7 }
 0x91f   : > { %v999_v8 = vpop.f32.mrf.mxu0 }
 0x920   : > { %vm1008_vm2 = vcmask 253952   ;;  %v1039_v35 = vld [vmem:[%s1717_s7 + $0x18] sm:$0xff]  ;;  %v1038_v55 = vld [vmem:[%s1717_s7 + $0x10] sm:$0xff]  ;;  %v1037_v16 = vld [vmem:[%s1717_s7 + $0x8] sm:$0xff]  ;;  %vm1092_vm7 = vcmask 122880  }
 0x921   : > { %v1009_v10 = vsel %vm1008_vm2, %v1001_v7, 0.0  ;;  %1057 = vmatpush.msra.mxu0 %v1039_v35  ;;  %v1036_v17 = vld [vmem:[%s1717_s7] sm:$0xff]  ;;  %v1066_v32 = vld [vmem:[%s1718_s8 + $0x8] sm:$0xff] }
 0x922   : > { %1010 = vadd.xlane.f32.xlu0 %v1009_v10  ;;  %v1007_v27 = vld [vmem:[%s1716_s6] sm:$0xff]  ;;  %1086 = vmatpush.msra.mxu1 %v1066_v32 }
 0x923   : > { %1058 = vmatpush.msra.mxu0 %v1038_v55  ;;  %v1033_v30 = vrot.slane %v1007_v27, 1  ;;  %v1065_v33 = vld [vmem:[%s1718_s8] sm:$0xff]  ;;  %v1040_v34 = vrot.slane %v1007_v27, 2  ;;  %v1067_v38 = vrot.slane %v1007_v27, 3 }
 0x924   : > { %1087 = vmatpush.msra.mxu1 %v1065_v33 }
 0x925   : > { %1059 = vmatpush.msra.mxu0 %v1037_v16 }
 0x927   : > { %1060 = vmatpush.msra.mxu0 %v1036_v17 }
 0x995   : > { %v1011_v11 = vpop.xlane.xlu0 %1010 }
 0x996   : > { %v1012_v12 = vmul.f32 %v1011_v11, %v1569_v9 }
 0x998   : > { %v1013_v13 = vsub.f32 %v1001_v7, %v1012_v12 }
 0x99a   : > { %v1014_v14 = vmul.f32 %v1013_v13, %v1013_v13 }
 0x99c   : > { %v1015_v15 = vsel %vm1008_vm2, %v1014_v14, 0.0 }
 0x99d   : > { %1016 = vadd.xlane.f32.xlu0 %v1015_v15 }
 0xa10   : > { %v1017_v18 = vpop.xlane.xlu0 %1016 }
 0xa11   : > { %v1018_v19 = vmul.f32 %v1017_v18, %v1569_v9 }
 0xa13   : > { %v1019_v20 = vadd.f32 1e-05, %v1018_v19 }
 0xa15   : > { %1385 = vrsqrt.f32 %v1019_v20  ;;  %vm1026_vm4 = vweird.f32 %v1019_v20 }
 0xa1b   : > { %v1386_v21 = vpop.eup %1385 }
 0xa1c   : > { %v1021_v22 = vmul.f32 %v1386_v21, %v1019_v20  ;;  %vm1027_vm3 = vweird.f32 %v1386_v21 }
 0xa1d   : > { %vm1028_vm5 = vmor %vm1026_vm4, %vm1027_vm3 }
 0xa1e   : > { %v1022_v23 = vmul.f32 %v1386_v21, %v1021_v22 }
 0xa20   : > { %v1023_v24 = vmul.f32 0.5, %v1022_v23 }
 0xa22   : > { %v1024_v25 = vsub.f32 1.5, %v1023_v24 }
 0xa24   : > { %v1025_v26 = vmul.f32 %v1386_v21, %v1024_v25 }
 0xa26   : > { %v1029_v28 = vsel %vm1028_vm5, %v1386_v21, %v1025_v26 }
 0xa27   : > { %v1030_v29 = vmul.f32 %v1029_v28, %v1013_v13 }
 0xa29   : > { %v1031_v31 = vmul.f32 %v1030_v29, %v1007_v27 }
 0xa2b   : > { %v1035_v9 = vadd.f32 %v1033_v30, %v1031_v31 }
 0xa2d   : > { %1305 = vmatmul.msk.f32.vlgmr.msra.gmra.mxu0 %vm432_vm1, %v1035_v9  ;;  %vm1094_vm1 = vcmask 24576  }
 0xaaa   : > { %v1062_v36 = vpop.f32.mrf.mxu0 }
 0xaab   : > { %v1063_v37 = vadd.f32 %v1062_v36, %v1040_v34 }
 0xaad   : > { %1093 = vst.msk [vmem:[#allocation5] sm:$0x1] %vm1092_vm7, %v1063_v37  ;;  %1306 = vmatmul.msk.f32.vlgmr.msra.gmra.mxu1 %vm523_vm6, %v1063_v37 }
 0xb2a   : > { %v1089_v39 = vpop.f32.mrf.mxu1 }
 0xb2b   : > { %v1090_v40 = vadd.f32 %v1089_v39, %v1067_v38 }
 0xb2d   : > { %1095 = vst.msk [vmem:[#allocation3] sm:$0x1] %vm1094_vm1, %v1090_v40 }
 0xb2e PF: > { %p1339_p6 = scmp.eq.s32.totalorder %s1530_s14, 1  ;;  %s1467_s20 = smov [#allocation3]  }
 0xb2f   : > { %s1102_s22 = sshll.u32 %s1467_s20, 4  ;;  %s1104_s23 = sshll.u32 %s1719_s9, 4  ;;  %s1103_s22 = int_to_ptr.vmem [resolvable:$true] %s1102_s22  ;;  %s1105_s23 = int_to_ptr.hbm [resolvable:$true] %s1104_s23 }
 0xb30   : > { %1332 = dma.vmem_to_hbm [thread:$0]  (%p1339_p6), %s1103_s22, 16, %s1105_s23, [#allocation4]  }
 0xb31   : > { %s1116_s28 = sshll.u32 %s1720_s10, 4  ;;  %s1468_s29 = smov [#allocation5]   ;;  %s1117_s28 = int_to_ptr.hbm [resolvable:$true] %s1116_s28 }
 0xb32   : > { %s1114_s30 = sshll.u32 %s1468_s29, 4  ;;  %s1115_s30 = int_to_ptr.vmem [resolvable:$true] %s1114_s30 }
 0xb33   : > { %1334 = dma.vmem_to_hbm [thread:$0]  (%p1339_p6), %s1115_s30, 16, %s1117_s28, [#allocation6]  }
 0xb34   : > { %1448 = dma.done.wait (%p1339_p6), [#allocation4], 16  }
 0xb35   : > { %1450 = vsyncadd (%p1339_p6), [#allocation4], 4294967280 }
 0xb36   : > { %1452 = dma.done.wait (%p1339_p6), [#allocation6], 16  }
 0xb37   : > { %1454 = vsyncadd (%p1339_p6), [#allocation6], 4294967280 }
 0xb38 PF: > { %s23_s13 = sadd.s32 1, %s1457_s13  }
 0xb39   : > { %p20_p7 = scmp.ge.s32.totalorder %s23_s13, 4  }
 0xb3b   :  { %22 = sbr.rel (!%p20_p7) target bundleno = 2 (0x2), region = 111 }
 0xb40   :  { %1135 = vsyncpa [#allocation4], 1 }
 0xb41   :  { %1137 = vsyncpa [#allocation4 + $0x1], 1 }
 0xb42   :  { %1138 = vsyncpa [#allocation6], 1 }

</bundles_post_ra>
